<compile_context>
chip_gen: v7x
topology: tpu7x:2x2x1
jax: 0.10.0
libtpu: 0.0.40
codegen_flags: <defaults>
</compile_context>

<pallas_src>
import math

import jax
import jax.numpy as jnp
from jax.experimental import pallas as pl
from jax.experimental.pallas import tpu as pltpu

_LANE = 128
_TILE_ROWS = 2048  # 2048 * 128 * 4 B = 1 MiB per f32 block


def _drop_path_kernel(x_ref, s_ref, o_ref):
    # x_ref / o_ref: (TILE_ROWS, 128) tile of x.
    # s_ref: (TILE_ROWS, 1) f32 per-row scale in {0, 1/keep_prob}.
    # Broadcast over lanes with a single vmul; cast keeps bf16 math in bf16.
    o_ref[...] = x_ref[...] * s_ref[...].astype(x_ref.dtype)


def drop_path(x, drop_prob: float, training: bool, key, *, tile_rows: int = _TILE_ROWS):
    """JAX/Pallas equivalent of the PyTorch drop_path(). Returns (out, u)."""
    if drop_prob == 0.0 or not training:
        return x, None

    keep_prob = 1.0 - drop_prob
    B = x.shape[0]
    N = math.prod(x.shape[1:])

    # Hoisted per-sample scalar math: Bernoulli(keep_prob)/keep_prob scale.
    u = jax.random.uniform(key, (B,), dtype=jnp.float32)
    scale = jnp.floor(jnp.float32(keep_prob) + u) / jnp.float32(keep_prob)

    # Lane-dense layout: each sample becomes rows of 128 lanes.  When
    # N % 128 == 0 (the common case) this is a pure metadata reshape — no
    # extra HBM pass.  Only the rare ragged-lane case pays a pad + slice.
    ragged_lanes = (N % _LANE) != 0
    n_pad = pl.cdiv(N, _LANE) * _LANE
    rows_per_sample = n_pad // _LANE
    total_rows = B * rows_per_sample

    x_flat = x.reshape(B, N)
    if ragged_lanes:
        x_flat = jnp.pad(x_flat, ((0, 0), (0, n_pad - N)))
    x2d = x_flat.reshape(total_rows, _LANE)

    # Per-row scale column: 1 f32 per 128 elements of x (~0.8% extra bytes).
    scale_rows = jnp.repeat(scale, rows_per_sample).reshape(total_rows, 1)

    # Fused 1-D row grid over B*rows.  Ragged final block (if any) gets a
    # masked writeback from Pallas — no dead-row padding needed.
    if total_rows <= tile_rows:
        block_rows = total_rows            # full-extent block is always legal
    else:
        block_rows = tile_rows             # multiple of 8
    grid = (pl.cdiv(total_rows, block_rows),)

    out2d = pl.pallas_call(
        _drop_path_kernel,
        out_shape=jax.ShapeDtypeStruct((total_rows, _LANE), x.dtype),
        grid=grid,
        in_specs=[
            pl.BlockSpec((block_rows, _LANE), lambda r: (r, 0)),
            pl.BlockSpec((block_rows, 1), lambda r: (r, 0)),
        ],
        out_specs=pl.BlockSpec((block_rows, _LANE), lambda r: (r, 0)),
        compiler_params=pltpu.CompilerParams(
            dimension_semantics=("parallel",),
        ),
    )(x2d, scale_rows)

    if ragged_lanes:
        out = out2d.reshape(B, n_pad)[:, :N].reshape(x.shape)
    else:
        out = out2d.reshape(x.shape)
    return out, u


class DropPath:
    """Drop paths (Stochastic Depth) per sample."""

    def __init__(self, drop_prob=None):
        self.drop_prob = drop_prob
        self.training = True

    def __call__(self, x, key, **kw):
        if self.drop_prob is None or self.drop_prob == 0.0 or not self.training:
            return x, None
        return drop_path(x, self.drop_prob, self.training, key, **kw)


if __name__ == "__main__":
    key = jax.random.PRNGKey(0)
    kx, kr, kx2, kr2, kx3, kr3 = jax.random.split(key, 6)

    drop_prob = 0.25
    keep_prob = 1.0 - drop_prob
    module = DropPath(drop_prob)

    # 1) Small NCHW input, N % 128 == 0 (common / no-pad fast path).
    B, C, H, W = 2, 4, 16, 16
    x = jax.random.normal(kx, (B, C, H, W), dtype=jnp.float32)
    out, u = module(x, kr)
    out = jax.block_until_ready(out)
    mask = jnp.floor(keep_prob + u).reshape((B,) + (1,) * (x.ndim - 1))
    expected = x / keep_prob * mask
    assert jnp.allclose(out, expected, atol=1e-6, rtol=1e-6)

    # 2) Ragged-lane shape (feature count not a multiple of 128) -> pad path.
    x2 = jax.random.normal(kx2, (2, 3, 7, 5), dtype=jnp.float32)
    out2, u2 = module(x2, kr2)
    out2 = jax.block_until_ready(out2)
    mask2 = jnp.floor(keep_prob + u2).reshape((2, 1, 1, 1))
    expected2 = x2 / keep_prob * mask2
    assert jnp.allclose(out2, expected2, atol=1e-6, rtol=1e-6)

    # 3) Multi-tile + ragged last row block path (small tile_rows for testing).
    x3 = jax.random.normal(kx3, (3, 6, 16, 16), dtype=jnp.float32)  # 36 rows total
    out3, u3 = module(x3, kr3, tile_rows=8)  # grid of 5, last block has 4 rows
    out3 = jax.block_until_ready(out3)
    mask3 = jnp.floor(keep_prob + u3).reshape((3, 1, 1, 1))
    expected3 = x3 / keep_prob * mask3
    assert jnp.allclose(out3, expected3, atol=1e-6, rtol=1e-6)

    # 4) eval / drop_prob == 0 path must be identity.
    module.training = False
    out_eval, _ = module(x, kr)
    assert jnp.array_equal(out_eval, x)

    print("KERNEL_OK")
</pallas_src>

<mosaic_0001>
module attributes {stable_mosaic.version = 11 : i64} {
  func.func @_drop_path_kernel(%arg0: i32, %arg1: memref<16x128xf32, #tpu.memory_space<vmem>>, %arg2: memref<16x1xf32, #tpu.memory_space<vmem>>, %arg3: memref<16x128xf32, #tpu.memory_space<vmem>>) attributes {dimension_semantics = [#tpu.dimension_semantics<parallel>], iteration_bounds = array<i64: 1>, scalar_prefetch = 0 : i64, scratch_operands = 0 : i64, tpu.core_type = #tpu.core_type<tc>, window_params = [{transform_indices = @transform_0, window_bounds = array<i64: 16, 128>}, {transform_indices = @transform_1, window_bounds = array<i64: 16, 1>}, {transform_indices = @transform_2, window_bounds = array<i64: 16, 128>}]} {
    %c0 = arith.constant 0 : index
    %c0_0 = arith.constant 0 : index
    %0 = vector.load %arg1[%c0, %c0_0] : memref<16x128xf32, #tpu.memory_space<vmem>>, vector<16x128xf32>
    %c0_1 = arith.constant 0 : index
    %c0_2 = arith.constant 0 : index
    %1 = vector.load %arg2[%c0_1, %c0_2] : memref<16x1xf32, #tpu.memory_space<vmem>>, vector<16x1xf32>
    %2 = vector.broadcast %1 : vector<16x1xf32> to vector<16x128xf32>
    %3 = arith.mulf %0, %2 : vector<16x128xf32>
    %c0_3 = arith.constant 0 : index
    %c0_4 = arith.constant 0 : index
    %4 = vector.load %arg3[%c0_3, %c0_4] : memref<16x128xf32, #tpu.memory_space<vmem>>, vector<16x128xf32>
    tpu.vector_store %arg3[%c0_3, %c0_4], %3 {strides = array<i32>} : memref<16x128xf32, #tpu.memory_space<vmem>>, vector<16x128xf32>,
    return
  }
  func.func @transform_0(%arg0: i32) -> (i32, i32) {
    %c0_i32 = arith.constant 0 : i32
    %c0_i32_0 = arith.constant 0 : i32
    return %arg0, %c0_i32 : i32, i32
  }
  func.func @transform_1(%arg0: i32) -> (i32, i32) {
    %c0_i32 = arith.constant 0 : i32
    %c0_i32_0 = arith.constant 0 : i32
    return %arg0, %c0_i32 : i32, i32
  }
  func.func @transform_2(%arg0: i32) -> (i32, i32) {
    %c0_i32 = arith.constant 0 : i32
    %c0_i32_0 = arith.constant 0 : i32
    return %arg0, %c0_i32 : i32, i32
  }
}

</mosaic_0001>

<bundles_post_ra>
// kernel: tpu_custom_call.1
= control target key start
LH: loop header
LB: loop body
LE: loop exit
PB: predicated region body
PF: predicated region fallthrough
CT: control target
= control target key end

     0   :  { %s118_s0 = inlined_call_operand.vmem [shape: f32[16,128], index: 0, kind: input, shape index: {}]   ;;  %s119_s1 = inlined_call_operand.vmem [shape: f32[16,1], index: 1, kind: input, shape index: {}]   ;;  %s120_s2 = inlined_call_operand.hbm [shape: f32[16,128], index: 2, kind: output, shape index: {}]  }
   0x1   :  { %v14_v0 = vld [vmem:[%s119_s1] sm:$0xff] }
   0x2   :  { %7 = vsyncpa [#allocation3], 0  ;;  %v75_v1 = vmov 0   ;;  %v15_v2 = vld [vmem:[%s119_s1 + $0x8] sm:$0xff]  ;;  %v12_v3 = vld [vmem:[%s118_s0] sm:$0xff]  ;;  %s76_s15 = smov [#allocation2]  }
   0x3   :  { %50 = vset.pattern.permute.xlu0 %v75_v1  ;;  %s35_s16 = sshll.u32 %s76_s15, 4  ;;  %v13_v6 = vld [vmem:[%s118_s0 + $0x8] sm:$0xff]  ;;  %s36_s16 = int_to_ptr.vmem [resolvable:$true] %s35_s16 }
   0x4   :  { %18 = vperm.xlu0 %50, %v14_v0   ;;  %s51_s19 = scalar_lea.vmem %s36_s16, 256  ;;  %p56_p1 = scmp.lt.s32.totalorder %s36_s16, %s36_s16 }
   0x5   :  { %p52_p0 = scmp.ne.s32.totalorder %s36_s16, %s51_s19  ;;  %p57_p2 = scmp.lt.s32.totalorder %s51_s19, %s51_s19 }
   0x7   :  { %p58_p3 = por %p57_p2, %p56_p1 }
   0x8   :  { %23 = vperm.xlu0 %50, %v15_v2  }
   0x9   :  { %p59_p4 = pnand %p58_p3, %p52_p0 }
  0x83   :  { %v19_v4 = vpop.permute.xlu0 %18 }
  0x84   :  { %v26_v5 = vmul.f32 %v19_v4, %v12_v3 }
  0x86   :  { %28 = vst [vmem:[#allocation2] sm:$0xff] %v26_v5 }
  0x87   :  { %v24_v7 = vpop.permute.xlu0 %23 }
  0x88   :  { %v27_v8 = vmul.f32 %v24_v7, %v13_v6 }
  0x8a   :  { %29 = vst [vmem:[#allocation2 + $0x8] sm:$0xff] %v27_v8 }
  0x8b   :  { %62 = shalt.err (!%p59_p4)
}
  0x8c   :  { %s63_s21 = scalar_lea.hbm %s120_s2, 256 }
  0x8d   :  { %p64_p5 = scmp.ne.s32.totalorder %s120_s2, %s63_s21  ;;  %p67_p6 = scmp.lt.u32.totalorder %s63_s21, %s120_s2 }
  0x8f   :  { %p69_p7 = pnand %p67_p6, %p64_p5 }
  0x91   :  { %72 = shalt.err (!%p69_p7)
}
  0x92   :  { %s77_s25 = smov 128   ;;  %s78_s26 = smov 8  }
  0x93   :  { %41 = dma.vmem_to_hbm [thread:$0]  %s36_s16, 256, %s120_s2, [#allocation3], %s77_s25, %s77_s25, %s78_s26  }
  0x94   :  { %73 = dma.done.wait [#allocation3], 256  }
  0x95   :  { %74 = vsyncadd [#allocation3], 4294967040 }
  0x96   :  { %45 = vsyncpa [#allocation3], 1 }

</bundles_post_ra>
